<compile_context>
chip_gen: v6e
topology: v6e:2x2x1
jax: 0.10.0
libtpu: 0.0.40
codegen_flags: <defaults>
</compile_context>

<pallas_src>
import jax
import jax.numpy as jnp
from jax.experimental import pallas as pl
from jax.experimental.pallas import tpu as pltpu


def _pse_kernel(x_ref, weff_ref, b1_ref, w2t_ref, b2_ref, o_ref):
    """One tile: x_ref is [C, T] (channels on sublanes, T pixels on lanes)."""
    x = x_ref[...].astype(jnp.float32)                                  # [C, T]

    # Channel mean fused into conv1:  W_eff[C16, C] = w1^T * (1/C)
    h = jnp.dot(weff_ref[...], x, preferred_element_type=jnp.float32)   # [C16, T]
    h = jnp.maximum(h + b1_ref[...], 0.0)                               # ReLU

    # conv2 (C16 -> C) as w2^T @ h on the MXU.
    logits = jnp.dot(w2t_ref[...], h,
                     preferred_element_type=jnp.float32) + b2_ref[...]  # [C, T]
    gate = jax.nn.sigmoid(logits)

    o_ref[...] = (x * gate).astype(o_ref.dtype)


def _choose_tile_hw(hw, c, itemsize, vmem_budget_bytes=16 << 20, max_tile=4096):
    """Largest lane tile (multiple of 128) s.t. double-buffered x+out tiles fit
    the VMEM budget; if H*W itself is smaller, use the full extent."""
    cap = vmem_budget_bytes // (4 * c * itemsize)   # 2 bufs x (x tile + out tile)
    cap = max(128, (cap // 128) * 128)
    tile = min(max_tile, cap)
    if hw <= tile:
        return hw                                   # full-dim block (always legal)
    return tile


def pse_forward(x_nchw, w1, b1, w2, b2, *, tile_hw=None):
    """x_nchw: [N, C, H, W] (float32 or bfloat16). Weights of the two 1x1 convs:
       w1: [1, C//16], b1: [1, C//16], w2: [C//16, C], b2: [1, C]."""
    n, c, h, w = x_nchw.shape
    c16 = w1.shape[1]
    assert c16 >= 1, "channels must be >= 16 (channels // 16 >= 1)"
    hw = h * w
    itemsize = jnp.dtype(x_nchw.dtype).itemsize

    if tile_hw is None:
        tile_hw = _choose_tile_hw(hw, c, itemsize)

    # NCHW -> [N, C, H*W] is a pure reshape (no data movement).
    x3 = x_nchw.reshape(n, c, hw)

    # Fold the channel mean into conv1 and transpose weights to the [C, T] layout.
    w_eff = jnp.broadcast_to(jnp.transpose(w1) * (1.0 / c), (c16, c))   # [C16, C]
    b1c = jnp.reshape(b1, (c16, 1))                                     # [C16, 1]
    w2t = jnp.transpose(w2)                                             # [C,  C16]
    b2c = jnp.reshape(b2, (c, 1))                                       # [C,  1]

    grid = (n, pl.cdiv(hw, tile_hw))

    cost = pl.CostEstimate(
        flops=int(4 * n * hw * c * c16 + 2 * n * hw * c),
        transcendentals=int(n * hw * c),
        bytes_accessed=int(2 * n * c * hw * itemsize),
    )

    out3 = pl.pallas_call(
        _pse_kernel,
        out_shape=jax.ShapeDtypeStruct((n, c, hw), x_nchw.dtype),
        grid_spec=pltpu.PrefetchScalarGridSpec(
            num_scalar_prefetch=0,
            grid=grid,
            in_specs=[
                pl.BlockSpec((None, c, tile_hw), lambda i, j: (i, 0, j)),  # x tile
                pl.BlockSpec((c16, c), lambda i, j: (0, 0)),               # W_eff
                pl.BlockSpec((c16, 1), lambda i, j: (0, 0)),               # b1
                pl.BlockSpec((c, c16), lambda i, j: (0, 0)),               # w2^T
                pl.BlockSpec((c, 1),   lambda i, j: (0, 0)),               # b2
            ],
            out_specs=pl.BlockSpec((None, c, tile_hw), lambda i, j: (i, 0, j)),
        ),
        compiler_params=pltpu.CompilerParams(
            dimension_semantics=("parallel", "parallel")),
        cost_estimate=cost,
    )(x3, w_eff, b1c, w2t, b2c)

    # [N, C, H*W] -> NCHW is again a pure reshape.
    return out3.reshape(n, c, h, w)


def pse_reference(x_nchw, w1, b1, w2, b2):
    """Pure-JAX reference mirroring the PyTorch forward (f32 math)."""
    n, c, h, w = x_nchw.shape
    xf = x_nchw.astype(jnp.float32)
    m = jnp.mean(xf, axis=1, keepdims=True)                   # [N,1,H,W]
    m = jnp.transpose(m, (0, 2, 3, 1)).reshape(-1, 1)         # [P,1]
    hdn = jnp.maximum(m @ w1 + b1, 0.0)                       # [P,C//16]
    gate = jax.nn.sigmoid(hdn @ w2 + b2)                      # [P,C]
    gate = jnp.transpose(gate.reshape(n, h, w, c), (0, 3, 1, 2))
    return xf * gate


if __name__ == "__main__":
    # Small deterministic example; channels >= 16 so channels // 16 >= 1.
    N, C, H, W = 2, 64, 16, 16
    C16 = C // 16

    key = jax.random.PRNGKey(0)
    kx, k1, k2, k3, k4 = jax.random.split(key, 5)

    x = jax.random.normal(kx, (N, C, H, W), dtype=jnp.float32)
    # conv1: Conv2d(1 -> C//16, k=1)  -> weight [C//16, 1, 1, 1], bias [C//16]
    w1 = jax.random.normal(k1, (1, C16), dtype=jnp.float32) * 0.5
    b1 = jax.random.normal(k2, (1, C16), dtype=jnp.float32) * 0.1
    # conv2: Conv2d(C//16 -> C, k=1)  -> weight [C, C//16, 1, 1], bias [C]
    w2 = jax.random.normal(k3, (C16, C), dtype=jnp.float32) * 0.5
    b2 = jax.random.normal(k4, (1, C), dtype=jnp.float32) * 0.1

    ref = pse_reference(x, w1, b1, w2, b2)

    # f32 I/O path.
    out = jax.block_until_ready(pse_forward(x, w1, b1, w2, b2))
    assert out.shape == (N, C, H, W)
    assert jnp.allclose(out, ref, atol=1e-5, rtol=1e-5)

    # bf16 I/O path (halves HBM traffic; in-kernel math stays f32).
    out_bf = jax.block_until_ready(pse_forward(x.astype(jnp.bfloat16), w1, b1, w2, b2))
    assert out_bf.dtype == jnp.bfloat16
    assert jnp.allclose(out_bf.astype(jnp.float32), ref, atol=5e-2, rtol=5e-2)

    print("KERNEL_OK")
</pallas_src>

<mosaic_0001>
module attributes {stable_mosaic.version = 11 : i64} {
  func.func @_pse_kernel(%arg0: i32, %arg1: i32, %arg2: memref<1x64x256xf32, #tpu.memory_space<vmem>>, %arg3: memref<4x64xf32, #tpu.memory_space<vmem>>, %arg4: memref<4x1xf32, #tpu.memory_space<vmem>>, %arg5: memref<64x4xf32, #tpu.memory_space<vmem>>, %arg6: memref<64x1xf32, #tpu.memory_space<vmem>>, %arg7: memref<1x64x256xf32, #tpu.memory_space<vmem>>) attributes {dimension_semantics = [#tpu.dimension_semantics<parallel>, #tpu.dimension_semantics<parallel>], iteration_bounds = array<i64: 2, 1>, scalar_prefetch = 0 : i64, scratch_operands = 0 : i64, tpu.core_type = #tpu.core_type<tc>, window_params = [{transform_indices = @transform_0, window_bounds = array<i64: 1, 64, 256>}, {pipeline_mode = #tpu.pipeline_mode<synchronous>, transform_indices = @transform_1, window_bounds = array<i64: 4, 64>}, {pipeline_mode = #tpu.pipeline_mode<synchronous>, transform_indices = @transform_2, window_bounds = array<i64: 4, 1>}, {pipeline_mode = #tpu.pipeline_mode<synchronous>, transform_indices = @transform_3, window_bounds = array<i64: 64, 4>}, {pipeline_mode = #tpu.pipeline_mode<synchronous>, transform_indices = @transform_4, window_bounds = array<i64: 64, 1>}, {transform_indices = @transform_5, window_bounds = array<i64: 1, 64, 256>}]} {
    %c0 = arith.constant 0 : index
    %c0_0 = arith.constant 0 : index
    %c0_1 = arith.constant 0 : index
    %0 = vector.load %arg2[%c0, %c0_0, %c0_1] : memref<1x64x256xf32, #tpu.memory_space<vmem>>, vector<1x64x256xf32>
    %1 = vector.shape_cast %0 : vector<1x64x256xf32> to vector<64x256xf32>
    %c0_2 = arith.constant 0 : index
    %c0_3 = arith.constant 0 : index
    %2 = vector.load %arg3[%c0_2, %c0_3] : memref<4x64xf32, #tpu.memory_space<vmem>>, vector<4x64xf32>
    %cst = arith.constant dense<0.000000e+00> : vector<4x256xf32>
    %3 = tpu.matmul %2, %1, %cst {dimension_numbers = #tpu.dot_dimension_numbers<[1], [0], [0], [1], [0, 0, 1, 1], [], []>} : vector<4x64xf32>, vector<64x256xf32>, vector<4x256xf32> -> vector<4x256xf32>
    %c0_4 = arith.constant 0 : index
    %c0_5 = arith.constant 0 : index
    %4 = vector.load %arg4[%c0_4, %c0_5] : memref<4x1xf32, #tpu.memory_space<vmem>>, vector<4x1xf32>
    %5 = vector.broadcast %4 : vector<4x1xf32> to vector<4x256xf32>
    %6 = arith.addf %3, %5 : vector<4x256xf32>
    %cst_6 = arith.constant 0.000000e+00 : f32
    %7 = vector.broadcast %cst_6 : f32 to vector<4x256xf32>
    %8 = arith.maximumf %6, %7 : vector<4x256xf32>
    %c0_7 = arith.constant 0 : index
    %c0_8 = arith.constant 0 : index
    %9 = vector.load %arg5[%c0_7, %c0_8] : memref<64x4xf32, #tpu.memory_space<vmem>>, vector<64x4xf32>
    %cst_9 = arith.constant dense<0.000000e+00> : vector<64x256xf32>
    %10 = tpu.matmul %9, %8, %cst_9 {dimension_numbers = #tpu.dot_dimension_numbers<[1], [0], [0], [1], [0, 0, 1, 1], [], []>} : vector<64x4xf32>, vector<4x256xf32>, vector<64x256xf32> -> vector<64x256xf32>
    %c0_10 = arith.constant 0 : index
    %c0_11 = arith.constant 0 : index
    %11 = vector.load %arg6[%c0_10, %c0_11] : memref<64x1xf32, #tpu.memory_space<vmem>>, vector<64x1xf32>
    %12 = vector.broadcast %11 : vector<64x1xf32> to vector<64x256xf32>
    %13 = arith.addf %10, %12 : vector<64x256xf32>
    %14 = arith.negf %13 : vector<64x256xf32>
    %15 = math.exp %14 : vector<64x256xf32>
    %cst_12 = arith.constant 1.000000e+00 : f32
    %16 = vector.broadcast %cst_12 : f32 to vector<64x256xf32>
    %17 = arith.addf %16, %15 : vector<64x256xf32>
    %18 = arith.divf %16, %17 : vector<64x256xf32>
    %19 = arith.mulf %1, %18 : vector<64x256xf32>
    %c0_13 = arith.constant 0 : index
    %c0_14 = arith.constant 0 : index
    %c0_15 = arith.constant 0 : index
    %20 = vector.load %arg7[%c0_13, %c0_14, %c0_15] : memref<1x64x256xf32, #tpu.memory_space<vmem>>, vector<1x64x256xf32>
    %21 = vector.shape_cast %20 : vector<1x64x256xf32> to vector<64x256xf32>
    %22 = vector.shape_cast %19 : vector<64x256xf32> to vector<1x64x256xf32>
    tpu.vector_store %arg7[%c0_13, %c0_14, %c0_15], %22 {strides = array<i32>} : memref<1x64x256xf32, #tpu.memory_space<vmem>>, vector<1x64x256xf32>,
    return
  }
  func.func @transform_0(%arg0: i32, %arg1: i32) -> (i32, i32, i32) {
    %c0_i32 = arith.constant 0 : i32
    %c0_i32_0 = arith.constant 0 : i32
    return %arg0, %c0_i32, %arg1 : i32, i32, i32
  }
  func.func @transform_1(%arg0: i32, %arg1: i32) -> (i32, i32) {
    %c0_i32 = arith.constant 0 : i32
    %c0_i32_0 = arith.constant 0 : i32
    %c0_i32_1 = arith.constant 0 : i32
    return %c0_i32, %c0_i32_0 : i32, i32
  }
  func.func @transform_2(%arg0: i32, %arg1: i32) -> (i32, i32) {
    %c0_i32 = arith.constant 0 : i32
    %c0_i32_0 = arith.constant 0 : i32
    %c0_i32_1 = arith.constant 0 : i32
    return %c0_i32, %c0_i32_0 : i32, i32
  }
  func.func @transform_3(%arg0: i32, %arg1: i32) -> (i32, i32) {
    %c0_i32 = arith.constant 0 : i32
    %c0_i32_0 = arith.constant 0 : i32
    %c0_i32_1 = arith.constant 0 : i32
    return %c0_i32, %c0_i32_0 : i32, i32
  }
  func.func @transform_4(%arg0: i32, %arg1: i32) -> (i32, i32) {
    %c0_i32 = arith.constant 0 : i32
    %c0_i32_0 = arith.constant 0 : i32
    %c0_i32_1 = arith.constant 0 : i32
    return %c0_i32, %c0_i32_0 : i32, i32
  }
  func.func @transform_5(%arg0: i32, %arg1: i32) -> (i32, i32, i32) {
    %c0_i32 = arith.constant 0 : i32
    %c0_i32_0 = arith.constant 0 : i32
    return %arg0, %c0_i32, %arg1 : i32, i32, i32
  }
}

</mosaic_0001>

<bundles_post_ra>
// kernel: tpu_custom_call.1
= control target key start
LH: loop header
LB: loop body
LE: loop exit
PB: predicated region body
PF: predicated region fallthrough
CT: control target
= control target key end

     0   :  { %10 = vsyncpa [#allocation3], 0  ;;  %s1445_s0 = inlined_call_operand.hbm [shape: f32[2,64,256], index: 0, kind: input, shape index: {}]   ;;  %s1446_s1 = inlined_call_operand.vmem [shape: f32[4,64], index: 1, kind: input, shape index: {}]   ;;  %s1447_s2 = inlined_call_operand.vmem [shape: f32[4,1], index: 2, kind: input, shape index: {}]   ;;  %s1448_s3 = inlined_call_operand.vmem [shape: f32[64,4], index: 3, kind: input, shape index: {}]   ;;  %s1449_s4 = inlined_call_operand.vmem [shape: f32[64,1], index: 4, kind: input, shape index: {}]   ;;  %s1450_s5 = inlined_call_operand.hbm [shape: f32[2,64,256], index: 5, kind: output, shape index: {}]  }
   0x1   :  { %12 = vsyncpa [#allocation3 + $0x1], 0 }
   0x2   :  { %13 = vsyncpa [#allocation4], 0 }
   0x3   :  { %15 = vsyncpa [#allocation4 + $0x1], 0  ;;  %s1123_s18 = smov 0   ;;  %s1125_s19 = smov 0  }
   0x4   :  { %s1127_s20 = smov 0   ;;  %s1129_s21 = smov 0  }
   0x5   :  { %s1131_s22 = smov 0   ;;  %s1133_s23 = smov 0  }
   0x6 LB: > { %s795_s24 = sadd.s32 4294967295, %s1083_s23   ;;  %s796_s25 = sadd.s32 4294967294, %s1083_s23   ;;  %s1083_s23 = sphi %s1133_s23, %s21_s23   ;;  %s1079_s22 = sphi %s1131_s22, %s1461_s22   ;;  %s1075_s21 = sphi %s1129_s21, %s1460_s21   ;;  %s1071_s20 = sphi %s1127_s20, %s1459_s20   ;;  %s1067_s19 = sphi %s1125_s19, %s1458_s19   ;;  %s1063_s18 = sphi %s1123_s18, %s1457_s18  }
   0x7   : > { %s33_s26 = sadd.s32 1, %s1079_s22  ;;  %s42_s27 = sadd.s32 1, %s1071_s20 }
   0x8   : > { %p35_p0 = scmp.ge.s32.totalorder %s33_s26, 2  ;;  %p49_p1 = scmp.ne.s32.totalorder %s1071_s20, %s1067_s19 }
   0x9   : > { %p50_p2 = scmp.eq.s32.totalorder %s1083_s23, 0  ;;  %p55_p3 = scmp.ne.s32.totalorder %s1067_s19, %s1063_s18 }
   0xa   : > { %s1463_s26 = smov (%p35_p0, %s33_s26), 0  ;;  %p56_p5 = scmp.eq.s32.totalorder %s795_s24, 0 }
   0xb   : > { %p1164_p4 = por %p50_p2, %p49_p1  ;;  %s37_s29 = ssub.s32 %s1079_s22, %s1463_s26 }
   0xc   : > { %p165_p6 = scmp.eq.s32.totalorder %s795_s24, 1  ;;  %p40_p7 = scmp.eq.s32.totalorder %s37_s29, 0 }
   0xd   : > { %p1170_p8 = por %p56_p5, %p55_p3  ;;  %p171_p10 = scmp.eq.s32.totalorder %s796_s25, 1 }
   0xe   : > { %p1174_p9 = por %p165_p6, %p49_p1  ;;  %p853_p13 = scmp.lt.s32.totalorder %s1083_s23, 2 }
   0xf   : > { %s1179_s7 = scalar_select %p40_p7, %s1071_s20, %s42_s27  }
  0x10   : > { %p1181_p11 = por %p171_p10, %p55_p3  ;;  %s203_s9 = sand.u32 1, %s1071_s20  }
  0x11   : > { %s799_s10 = sshll.u32 %s203_s9, 7  ;;  %s837_s11 = sshll.u32 %s1079_s22, 11 }
  0x12   : > { %s215_s14 = scalar_lea.hbm %s1445_s0, %s837_s11  ;;  %s207_s15 = scalar_lea.vmem [#allocation2], %s799_s10 }
  0x13   : > { %s216_s16 = sshll.u32 %s207_s15, 4  ;;  %p1194_p0 = pnand %p853_p13, %p1164_p4  ;;  %s217_s16 = int_to_ptr.vmem [resolvable:$true] %s216_s16 }
  0x14   : > { %p802_p1 = scmp.ge.s32.totalorder %s1083_s23, 1  ;;  %s204_s24 = scalar_lea.sflag [#allocation3], %s203_s9 }
  0x15   : > { %p977_p2 = pneg %p1194_p0  ;;  %s988_s25 = scalar_lea.vmem %s217_s16, 2048 }
  0x16   : > { %p989_p3 = scmp.ne.s32.totalorder %s217_s16, %s988_s25  ;;  %s1085_s27 = smov [#allocation2]  }
  0x17   : > { %s993_s29 = sshll.u32 %s1085_s27, 4  ;;  %s994_s29 = int_to_ptr.vmem [resolvable:$false] %s993_s29 }
  0x18   : > { %p991_p5 = pnand %p989_p3, %p977_p2  ;;  %s995_s10 = scalar_lea.vmem %s994_s29, 4096 }
  0x19   : > { %p996_p7 = scmp.lt.s32.totalorder %s217_s16, %s994_s29  ;;  %p997_p10 = scmp.lt.s32.totalorder %s995_s10, %s988_s25 }
  0x1a   : > { %p992_p6 = pneg %p991_p5 }
  0x1b   : > { %p998_p12 = por %p997_p10, %p996_p7 }
  0x1d   : > { %p999_p4 = pnand %p998_p12, %p992_p6 }
  0x1f   : > { %1002 = shalt.err (!%p999_p4)
}
  0x20   : > { %s1086_s28 = smov 256   ;;  %s1087_s9 = smov 16  }
  0x21   : > { %848 = dma.hbm_to_vmem [thread:$0]  (!%p1194_p0), %s215_s14, 2048, %s217_s16, %s204_s24, %s1086_s28, %s1086_s28, %s1087_s9  }
  0x22   : > { %p224_p13 = scmp.lt.s32.totalorder %s1083_s23, 3 }
  0x24   : > { %p225_p2 = pnand %p802_p1, %p224_p13 }
  0x25   : > { %s1207_s11 = sand.u32 (!%p225_p2), 1, %s1067_s19  }
  0x26   : > { %228 = sbr.rel (%p225_p2) target bundleno = 538 (0x21a), region = 40  ;;  %s803_s12 = sshll.u32 (!%p225_p2), %s1207_s11, 7 }
  0x27   : > { %s231_s13 = scalar_lea.sflag (!%p225_p2), [#allocation3], %s1207_s11  ;;  %s1213_s15 = scalar_lea.vmem (!%p225_p2), [#allocation2], %s803_s12 }
  0x2b   : > { %1054 = dma.done.wait (%p1170_p8), %s231_s13, 2048  }
  0x2c   : > { %1056 = vsyncadd (%p1170_p8), %s231_s13, 4294965248  ;;  %v1088_v0 = vmov 0.0   ;;  %v1089_v1 = vmov 0   ;;  %v1222_v2 = vld [vmem:[%s1213_s15 + $0x78] sm:$0xff]  ;;  %v1225_v3 = vld [vmem:[%s1213_s15 + $0x70] sm:$0xff]  ;;  %vm286_vm0 = vcmask 523264  }
  0x2d   : > { %354 = vmatprep.mubr.f32.mxu0 %v1088_v0  ;;  %909 = vset.pattern.permute.xlu0 %v1089_v1  ;;  %v1228_v4 = vld [vmem:[%s1213_s15 + $0x68] sm:$0xff]  ;;  %v1232_v5 = vld [vmem:[%s1213_s15 + $0x60] sm:$0xff]  ;;  %v1236_v6 = vld [vmem:[%s1213_s15 + $0x58] sm:$0xff]  ;;  %vm444_vm1 = vcmask 1043456   ;;  %vm419_vm2 = vcmask 31744   ;;  %s1358_s9 = scalar_lea.vmem [#allocation5], %s803_s12 }
  0x2e   : > { %521 = vmatprep.mubr.f32.mxu1 %v1088_v0  ;;  %910 = vset.pattern.permute.xlu1 %v1089_v1  ;;  %v1240_v7 = vld [vmem:[%s1213_s15 + $0x50] sm:$0xff]  ;;  %v1244_v8 = vld [vmem:[%s1213_s15 + $0x48] sm:$0xff]  ;;  %v1248_v9 = vld [vmem:[%s1213_s15 + $0x40] sm:$0xff]  ;;  %s838_s12 = sshll.u32 %s1075_s21, 11  ;;  %s708_s13 = sshll.u32 %s1358_s9, 4  ;;  %s1394_s13 = int_to_ptr.vmem [resolvable:$true] %s708_s13 }
  0x2f   : > { %306 = vmatprep.subr.mxu0 %v1222_v2  ;;  %v280_v10 = vld [vmem:[%s1447_s2] sm:$0xf]  ;;  %v1255_v11 = vld [vmem:[%s1213_s15 + $0x38] sm:$0xff]  ;;  %v1259_v12 = vld [vmem:[%s1213_s15 + $0x30] sm:$0xff]  ;;  %s1392_s14 = scalar_lea.hbm %s1450_s5, %s838_s12  ;;  %s693_s21 = scalar_lea.sflag [#allocation4], %s1207_s11 }
  0x30   : > { %307 = vmatpush1.msra.mxu0 %v1225_v3  ;;  %283 = vperm.xlu0 %909, %v280_v10   ;;  %v371_v13 = vld [vmem:[%s1449_s4] sm:$0xff]  ;;  %v1266_v14 = vld [vmem:[%s1213_s15 + $0x28] sm:$0xff]  ;;  %v1274_v16 = vld [vmem:[%s1213_s15 + $0x18] sm:$0xff]  ;;  %s1003_s16 = scalar_lea.vmem %s1394_s13, 2048  ;;  %s1090_s17 = smov [#allocation5]  }
  0x31   : > { %308 = vmatprep.subr.mxu0 %v1228_v4  ;;  %v1270_v15 = vld [vmem:[%s1213_s15 + $0x20] sm:$0xff]  ;;  %v1278_v17 = vld [vmem:[%s1213_s15 + $0x10] sm:$0xff]  ;;  %v374_v18 = vld [vmem:[%s1449_s4 + $0x18] sm:$0xff]  ;;  %p1004_p8 = scmp.ne.s32.totalorder %s1394_s13, %s1003_s16  ;;  %s1007_s24 = sshll.u32 %s1090_s17, 4  ;;  %s1008_s24 = int_to_ptr.vmem [resolvable:$false] %s1007_s24 }
  0x32   : > { %309 = vmatpush1.msra.mxu0 %v1232_v5  ;;  %v1285_v19 = vld [vmem:[%s1213_s15 + $0x8] sm:$0xff]  ;;  %v1289_v20 = vld [vmem:[%s1213_s15] sm:$0xff]  ;;  %v378_v23 = vld [vmem:[%s1449_s4 + $0x38] sm:$0xff]  ;;  %s1009_s25 = scalar_lea.vmem %s1008_s24, 4096  ;;  %p1010_p1 = scmp.lt.s32.totalorder %s1394_s13, %s1008_s24 }
  0x33   : > { %310 = vmatprep.subr.mxu0 %v1236_v6  ;;  %v279_v21 = vld [vmem:[%s1446_s1] sm:$0xf]  ;;  %v376_v22 = vld [vmem:[%s1449_s4 + $0x28] sm:$0xff]  ;;  %v373_v25 = vld [vmem:[%s1449_s4 + $0x10] sm:$0xff]  ;;  %p1005_p12 = pnand %p1004_p8, %p1174_p9  ;;  %p1011_p3 = scmp.lt.s32.totalorder %s1009_s25, %s1003_s16 }
  0x34   : > { %311 = vmatpush1.msra.mxu0 %v1240_v7  ;;  %381 = vperm.xlu0 %909, %v371_v13   ;;  %v372_v24 = vld [vmem:[%s1449_s4 + $0x8] sm:$0xff]  ;;  %v375_v26 = vld [vmem:[%s1449_s4 + $0x20] sm:$0xff]  ;;  %v377_v27 = vld [vmem:[%s1449_s4 + $0x30] sm:$0xff] }
  0x35   : > { %312 = vmatprep.subr.mxu0 %v1244_v8  ;;  %386 = vperm.xlu1 %910, %v372_v24   ;;  %v363_v35 = vld [vmem:[%s1448_s3] sm:$0xff]  ;;  %v364_v36 = vld [vmem:[%s1448_s3 + $0x8] sm:$0xff]  ;;  %v365_v37 = vld [vmem:[%s1448_s3 + $0x10] sm:$0xff]  ;;  %p1006_p0 = pneg %p1005_p12  ;;  %p1012_p5 = por %p1011_p3, %p1010_p1 }
  0x36   : > { %313 = vmatpush1.msra.mxu0 %v1248_v9  ;;  %v366_v38 = vld [vmem:[%s1448_s3 + $0x18] sm:$0xff]  ;;  %v367_v39 = vld [vmem:[%s1448_s3 + $0x20] sm:$0xff]  ;;  %v368_v40 = vld [vmem:[%s1448_s3 + $0x28] sm:$0xff] }
  0x37   : > { %314 = vmatprep.subr.mxu0 %v1255_v11  ;;  %v369_v41 = vld [vmem:[%s1448_s3 + $0x30] sm:$0xff]  ;;  %v370_v42 = vld [vmem:[%s1448_s3 + $0x38] sm:$0xff]  ;;  %p1013_p6 = pnand %p1012_p5, %p1006_p0 }
  0x38   : > { %315 = vmatpush1.msra.mxu0 %v1259_v12  ;;  %396 = vperm.xlu0 %909, %v374_v18  }
  0x39   : > { %316 = vmatprep.subr.mxu0 %v1266_v14  ;;  %391 = vperm.xlu1 %910, %v373_v25  }
  0x3a   : > { %317 = vmatpush1.msra.mxu0 %v1270_v15 }
  0x3b   : > { %318 = vmatprep.subr.mxu0 %v1274_v16 }
  0x3c   : > { %319 = vmatpush1.msra.mxu0 %v1278_v17  ;;  %406 = vperm.xlu0 %909, %v376_v22  }
  0x3d   : > { %320 = vmatprep.subr.mxu0 %v1285_v19  ;;  %401 = vperm.xlu1 %910, %v375_v26  }
  0x3e   : > { %321 = vmatpush1.msra.mxu0 %v1289_v20 }
  0x3f   : > { %805 = vmatmul.mubr.msk.f32.vlgmr.msra.gmra.mxu0 %vm286_vm0, %v279_v21 }
  0x40   : > { %515 = vmatprep.mubr.f32.mxu0 %v1088_v0  ;;  %416 = vperm.xlu0 %909, %v378_v23  }
  0x41   : > { %411 = vperm.xlu1 %910, %v377_v27  }
  0xab   : > { %v284_v29 = vpop.permute.xlu0 %283 }
  0xaf   : > { %v382_v44 = vpop.permute.xlu0 %381 }
  0xb0   : > { %v387_v43 = vpop.permute.xlu1 %386 }
  0xb3   : > { %v397_v63 = vpop.permute.xlu0 %396 }
  0xb4   : > { %v392_v49 = vpop.permute.xlu1 %391 }
  0xb8   : > { %v402_v22 = vpop.permute.xlu1 %401 }
  0xff   : > { %v356_v28 = vpop.f32.mrf.mxu0 }
 0x100   : > { %v357_v30 = vadd.f32 %v356_v28, %v284_v29 }
 0x101   : > { %v358_v31 = vpop.f32.mrf.mxu0 }
 0x102   : > { %v359_v32 = vadd.f32 %v358_v31, %v284_v29  ;;  %v361_v34 = vmax.f32 %v357_v30, 0.0  ;;  %v407_v30 = vpop.permute.xlu0 %406 }
 0x104   : > { %v362_v33 = vmax.f32 %v359_v32, 0.0 }
 0x106   : > { %806 = vmatprep.subr.msk.mxu0 %vm444_vm1, %v362_v33  ;;  %839 = vmatprep.subr.msk.mxu1 %vm444_vm1, %v362_v33 }
 0x107   : > { %807 = vmatpush1.msk.msra.mxu0 %vm444_vm1, %v361_v34  ;;  %840 = vmatpush1.msk.msra.mxu1 %vm444_vm1, %v361_v34 }
 0x108   : > { %808 = vmatmul.mubr.msk.f32.vlgmr.msra.gmra.mxu0 %vm419_vm2, %v363_v35  ;;  %809 = vmatmul.mubr.msk.f32.vlgmr.msra.gmra.mxu1 %vm419_vm2, %v364_v36 }
 0x109   : > { %527 = vmatprep.mubr.f32.mxu1 %v1088_v0 }
 0x10c   : > { %810 = vmatmul.mubr.msk.f32.gmra.mxu1 %vm419_vm2, %v365_v37 }
 0x10d   : > { %533 = vmatprep.mubr.f32.mxu1 %v1088_v0 }
 0x110   : > { %811 = vmatmul.mubr.msk.f32.gmra.mxu1 %vm419_vm2, %v366_v38 }
 0x111   : > { %539 = vmatprep.mubr.f32.mxu1 %v1088_v0 }
 0x114   : > { %812 = vmatmul.mubr.msk.f32.gmra.mxu1 %vm419_vm2, %v367_v39 }
 0x115   : > { %545 = vmatprep.mubr.f32.mxu1 %v1088_v0 }
 0x118   : > { %813 = vmatmul.mubr.msk.f32.gmra.mxu1 %vm419_vm2, %v368_v40 }
 0x119   : > { %551 = vmatprep.mubr.f32.mxu1 %v1088_v0 }
 0x11c   : > { %814 = vmatmul.mubr.msk.f32.gmra.mxu1 %vm419_vm2, %v369_v41 }
 0x11d   : > { %557 = vmatprep.mubr.f32.mxu1 %v1088_v0 }
 0x120   : > { %815 = vmatmul.mubr.msk.f32.gmra.mxu1 %vm419_vm2, %v370_v42 }
 0x1c8   : > { %v517_v45 = vpop.f32.mrf.mxu0  ;;  %v523_v46 = vpop.f32.mrf.mxu1 }
 0x1c9   : > { %v518_v47 = vadd.f32 %v517_v45, %v382_v44  ;;  %v524_v48 = vadd.f32 %v523_v46, %v387_v43 }
 0x1ca   : > { %v519_v50 = vpop.f32.mrf.mxu0  ;;  %v525_v51 = vpop.f32.mrf.mxu1 }
 0x1cb   : > { %v816_v52 = vmul.f32 -1.442695, %v518_v47  ;;  %v818_v53 = vmul.f32 -1.442695, %v524_v48  ;;  %v520_v54 = vadd.f32 %v519_v50, %v382_v44  ;;  %v526_v55 = vadd.f32 %v525_v51, %v387_v43  ;;  %v412_v43 = vpop.permute.xlu1 %411 }
 0x1cc   : > { %v529_v56 = vpop.f32.mrf.mxu1 }
 0x1cd   : > { %911 = vpow2.f32 %v816_v52  ;;  %v817_v57 = vmul.f32 -1.442695, %v520_v54  ;;  %v819_v58 = vmul.f32 -1.442695, %v526_v55  ;;  %v530_v59 = vadd.f32 %v529_v56, %v392_v49  ;;  %v417_v54 = vpop.permute.xlu0 %416 }
 0x1ce   : > { %913 = vpow2.f32 %v818_v53  ;;  %v531_v60 = vpop.f32.mrf.mxu1 }
 0x1cf   : > { %915 = vpow2.f32 %v817_v57  ;;  %v820_v61 = vmul.f32 -1.442695, %v530_v59  ;;  %v532_v62 = vadd.f32 %v531_v60, %v392_v49 }
 0x1d0   : > { %917 = vpow2.f32 %v819_v58  ;;  %v535_v0 = vpop.f32.mrf.mxu1 }
 0x1d1   : > { %919 = vpow2.f32 %v820_v61  ;;  %v821_v1 = vmul.f32 -1.442695, %v532_v62  ;;  %v536_v10 = vadd.f32 %v535_v0, %v397_v63 }
 0x1d2   : > { %v537_v13 = vpop.f32.mrf.mxu1 }
 0x1d3   : > { %921 = vpow2.f32 %v821_v1  ;;  %v822_v18 = vmul.f32 -1.442695, %v536_v10  ;;  %v538_v21 = vadd.f32 %v537_v13, %v397_v63 }
 0x1d4   : > { %v541_v23 = vpop.f32.mrf.mxu1 }
 0x1d5   : > { %923 = vpow2.f32 %v822_v18  ;;  %v823_v24 = vmul.f32 -1.442695, %v538_v21  ;;  %v542_v25 = vadd.f32 %v541_v23, %v402_v22 }
 0x1d6   : > { %v543_v26 = vpop.f32.mrf.mxu1 }
 0x1d7   : > { %925 = vpow2.f32 %v823_v24  ;;  %v824_v27 = vmul.f32 -1.442695, %v542_v25  ;;  %v544_v28 = vadd.f32 %v543_v26, %v402_v22 }
 0x1d8   : > { %v547_v29 = vpop.f32.mrf.mxu1 }
 0x1d9   : > { %927 = vpow2.f32 %v824_v27  ;;  %v825_v31 = vmul.f32 -1.442695, %v544_v28  ;;  %v548_v33 = vadd.f32 %v547_v29, %v407_v30 }
 0x1da   : > { %v912_v32 = vpop.eup %911  ;;  %v549_v34 = vpop.f32.mrf.mxu1 }
 0x1db   : > { %v914_v35 = vpop.eup %913  ;;  %v612_v36 = vadd.f32 1.0, %v912_v32  ;;  %929 = vpow2.f32 %v825_v31  ;;  %v550_v39 = vadd.f32 %v549_v34, %v407_v30  ;;  %v826_v46 = vmul.f32 -1.442695, %v548_v33 }
 0x1dc   : > { %v916_v37 = vpop.eup %915  ;;  %v614_v38 = vadd.f32 1.0, %v914_v35  ;;  %v553_v40 = vpop.f32.mrf.mxu1 }
 0x1dd   : > { %v918_v41 = vpop.eup %917  ;;  %931 = vrcp.f32 %v612_v36  ;;  %v613_v42 = vadd.f32 1.0, %v916_v37  ;;  %v554_v47 = vadd.f32 %v553_v40, %v412_v43  ;;  %v827_v51 = vmul.f32 -1.442695, %v550_v39 }
 0x1de   : > { %v920_v44 = vpop.eup %919  ;;  %933 = vrcp.f32 %v614_v38  ;;  %v615_v45 = vadd.f32 1.0, %v918_v41  ;;  %v555_v48 = vpop.f32.mrf.mxu1 }
 0x1df   : > { %935 = vrcp.f32 %v613_v42  ;;  %v616_v49 = vadd.f32 1.0, %v920_v44  ;;  %v556_v52 = vadd.f32 %v555_v48, %v412_v43  ;;  %v828_v57 = vmul.f32 -1.442695, %v554_v47 }
 0x1e0   : > { %v922_v50 = vpop.eup %921  ;;  %937 = vrcp.f32 %v615_v45  ;;  %v559_v53 = vpop.f32.mrf.mxu1 }
 0x1e1   : > { %939 = vrcp.f32 %v616_v49  ;;  %v617_v55 = vadd.f32 1.0, %v922_v50  ;;  %v560_v58 = vadd.f32 %v559_v53, %v417_v54  ;;  %v829_v62 = vmul.f32 -1.442695, %v556_v52 }
 0x1e2   : > { %v924_v56 = vpop.eup %923  ;;  %941 = vpow2.f32 %v826_v46  ;;  %v561_v59 = vpop.f32.mrf.mxu1 }
 0x1e3   : > { %943 = vrcp.f32 %v617_v55  ;;  %v618_v60 = vadd.f32 1.0, %v924_v56  ;;  %v562_v63 = vadd.f32 %v561_v59, %v417_v54  ;;  %v830_v10 = vmul.f32 -1.442695, %v560_v58 }
 0x1e4   : > { %v926_v61 = vpop.eup %925  ;;  %945 = vpow2.f32 %v827_v51 }
 0x1e5   : > { %947 = vrcp.f32 %v618_v60  ;;  %v619_v0 = vadd.f32 1.0, %v926_v61  ;;  %v831_v21 = vmul.f32 -1.442695, %v562_v63 }
 0x1e6   : > { %v928_v1 = vpop.eup %927  ;;  %949 = vpow2.f32 %v828_v57 }
 0x1e7   : > { %951 = vrcp.f32 %v619_v0  ;;  %v620_v13 = vadd.f32 1.0, %v928_v1 }
 0x1e8   : > { %v930_v18 = vpop.eup %929  ;;  %953 = vpow2.f32 %v829_v62 }
 0x1e9   : > { %955 = vrcp.f32 %v620_v13  ;;  %v621_v22 = vadd.f32 1.0, %v930_v18 }
 0x1ea   : > { %v932_v23 = vpop.eup %931  ;;  %957 = vpow2.f32 %v830_v10 }
 0x1eb   : > { %v934_v24 = vpop.eup %933  ;;  %v660_v25 = vmul.f32 %v932_v23, %v1289_v20  ;;  %959 = vrcp.f32 %v621_v22 }
 0x1ec   : > { %v936_v26 = vpop.eup %935  ;;  %v662_v27 = vmul.f32 %v934_v24, %v1278_v17  ;;  %961 = vpow2.f32 %v831_v21 }
 0x1ed   : > { %v938_v28 = vpop.eup %937  ;;  %676 = vst [vmem:[%s1358_s9] sm:$0xff] %v660_v25  ;;  %v661_v29 = vmul.f32 %v936_v26, %v1285_v19 }
 0x1ee   : > { %v940_v30 = vpop.eup %939  ;;  %678 = vst [vmem:[%s1358_s9 + $0x10] sm:$0xff] %v662_v27  ;;  %v663_v20 = vmul.f32 %v938_v28, %v1274_v16 }
 0x1ef   : > { %v942_v31 = vpop.eup %941  ;;  %677 = vst [vmem:[%s1358_s9 + $0x8] sm:$0xff] %v661_v29  ;;  %v664_v17 = vmul.f32 %v940_v30, %v1270_v15 }
 0x1f0   : > { %v944_v32 = vpop.eup %943  ;;  %679 = vst [vmem:[%s1358_s9 + $0x18] sm:$0xff] %v663_v20  ;;  %v622_v33 = vadd.f32 1.0, %v942_v31 }
 0x1f1   : > { %v946_v34 = vpop.eup %945  ;;  %680 = vst [vmem:[%s1358_s9 + $0x20] sm:$0xff] %v664_v17  ;;  %v665_v35 = vmul.f32 %v944_v32, %v1266_v14 }
 0x1f2   : > { %v948_v36 = vpop.eup %947  ;;  %963 = vrcp.f32 %v622_v33  ;;  %v623_v19 = vadd.f32 1.0, %v946_v34 }
 0x1f3   : > { %v950_v37 = vpop.eup %949  ;;  %681 = vst [vmem:[%s1358_s9 + $0x28] sm:$0xff] %v665_v35  ;;  %v666_v16 = vmul.f32 %v948_v36, %v1259_v12 }
 0x1f4   : > { %v952_v38 = vpop.eup %951  ;;  %965 = vrcp.f32 %v623_v19  ;;  %v624_v15 = vadd.f32 1.0, %v950_v37 }
 0x1f5   : > { %v954_v39 = vpop.eup %953  ;;  %682 = vst [vmem:[%s1358_s9 + $0x30] sm:$0xff] %v666_v16  ;;  %v667_v40 = vmul.f32 %v952_v38, %v1255_v11 }
 0x1f6   : > { %v956_v41 = vpop.eup %955  ;;  %967 = vrcp.f32 %v624_v15  ;;  %v625_v14 = vadd.f32 1.0, %v954_v39 }
 0x1f7   : > { %v958_v42 = vpop.eup %957  ;;  %683 = vst [vmem:[%s1358_s9 + $0x38] sm:$0xff] %v667_v40  ;;  %v668_v43 = vmul.f32 %v956_v41, %v1248_v9 }
 0x1f8   : > { %v960_v44 = vpop.eup %959  ;;  %969 = vrcp.f32 %v625_v14  ;;  %v626_v12 = vadd.f32 1.0, %v958_v42 }
 0x1f9   : > { %v962_v45 = vpop.eup %961  ;;  %684 = vst [vmem:[%s1358_s9 + $0x40] sm:$0xff] %v668_v43  ;;  %v669_v46 = vmul.f32 %v960_v44, %v1244_v8 }
 0x1fa   : > { %971 = vrcp.f32 %v626_v12  ;;  %v627_v11 = vadd.f32 1.0, %v962_v45 }
 0x1fb   : > { %685 = vst [vmem:[%s1358_s9 + $0x48] sm:$0xff] %v669_v46 }
 0x1fc   : > { %973 = vrcp.f32 %v627_v11 }
 0x1ff   : > { %v964_v47 = vpop.eup %963 }
 0x200   : > { %v670_v48 = vmul.f32 %v964_v47, %v1240_v7 }
 0x201   : > { %v966_v9 = vpop.eup %965 }
 0x202   : > { %686 = vst [vmem:[%s1358_s9 + $0x50] sm:$0xff] %v670_v48  ;;  %v671_v49 = vmul.f32 %v966_v9, %v1236_v6 }
 0x203   : > { %v968_v50 = vpop.eup %967 }
 0x204   : > { %687 = vst [vmem:[%s1358_s9 + $0x58] sm:$0xff] %v671_v49  ;;  %v672_v8 = vmul.f32 %v968_v50, %v1232_v5 }
 0x205   : > { %v970_v51 = vpop.eup %969 }
 0x206   : > { %688 = vst [vmem:[%s1358_s9 + $0x60] sm:$0xff] %v672_v8  ;;  %v673_v52 = vmul.f32 %v970_v51, %v1228_v4 }
 0x207   : > { %v972_v53 = vpop.eup %971 }
 0x208   : > { %689 = vst [vmem:[%s1358_s9 + $0x68] sm:$0xff] %v673_v52  ;;  %v674_v7 = vmul.f32 %v972_v53, %v1225_v3 }
 0x209   : > { %v974_v54 = vpop.eup %973 }
 0x20a   : > { %690 = vst [vmem:[%s1358_s9 + $0x70] sm:$0xff] %v674_v7  ;;  %v675_v4 = vmul.f32 %v974_v54, %v1222_v2 }
 0x20c   : > { %691 = vst [vmem:[%s1358_s9 + $0x78] sm:$0xff] %v675_v4 }
 0x20d   : > { %1016 = shalt.err (!%p1013_p6)
}
 0x20e   : > { %s1017_s27 = scalar_lea.hbm %s1392_s14, 2048  ;;  %s1021_s28 = scalar_lea.hbm %s1450_s5, 4096 }
 0x20f   : > { %p1018_p7 = scmp.ne.s32.totalorder %s1392_s14, %s1017_s27  ;;  %p1022_p13 = scmp.lt.s32.totalorder %s1392_s14, %s1450_s5 }
 0x210   : > { %p1023_p2 = scmp.lt.s32.totalorder %s1021_s28, %s1017_s27 }
 0x211   : > { %p1019_p10 = pnand %p1018_p7, %p1174_p9 }
 0x212   : > { %p1024_p8 = por %p1023_p2, %p1022_p13 }
 0x213   : > { %p1020_p4 = pneg %p1019_p10 }
 0x215   : > { %p1025_p12 = pnand %p1024_p8, %p1020_p4 }
 0x217   : > { %1028 = shalt.err (!%p1025_p12)
}
 0x218   : > { %s1091_s15 = smov 256   ;;  %s1092_s30 = smov 16  }
 0x219   : > { %843 = dma.vmem_to_hbm [thread:$0]  (%p1174_p9), %s1394_s13, 2048, %s1392_s14, %s693_s21, %s1091_s15, %s1091_s15, %s1092_s30  }
 0x21a PF: > { %s723_s16 = sand.u32 1, %s1063_s18   ;;  %p1456_p0 = scmp.ge.s32.totalorder %s1083_s23, 2 }
 0x21b   : > { %s724_s17 = scalar_lea.sflag [#allocation4], %s723_s16 }
 0x21c   : > { %p850_p1 = pnand %p1456_p0, %p1181_p11 }
 0x21e   : > { %p851_p3 = pneg %p850_p1 }
 0x220   : > { %1058 = dma.done.wait (%p851_p3), %s724_s17, 2048  }
 0x221   : > { %1060 = vsyncadd (%p851_p3), %s724_s17, 4294965248  ;;  %s21_s23 = sadd.s32 1, %s1083_s23   ;;  %s1457_s18 = smov %s1067_s19 }
 0x222   : > { %p18_p5 = scmp.ge.s32.totalorder %s21_s23, 4   ;;  %s1458_s19 = smov %s1071_s20 }
 0x223   : > { %s1459_s20 = smov %s1179_s7  ;;  %s1460_s21 = smov %s1079_s22 }
 0x224   : > { %s1461_s22 = smov %s1463_s26  ;;  %20 = sbr.rel (!%p18_p5) target bundleno = 6 (0x6), region = 85 }
 0x229   :  { %729 = vsyncpa [#allocation3], 1 }
 0x22a   :  { %731 = vsyncpa [#allocation3 + $0x1], 1 }
 0x22b   :  { %732 = vsyncpa [#allocation4], 1 }
 0x22c   :  { %734 = vsyncpa [#allocation4 + $0x1], 1 }

</bundles_post_ra>
